<compile_context>
chip_gen: v6e
topology: v6e:2x2x1
jax: 0.10.0
libtpu: 0.0.40
codegen_flags: <defaults>
</compile_context>

<pallas_src>
import functools

import jax
import jax.numpy as jnp
from jax import lax
from jax.experimental import pallas as pl
from jax.experimental.pallas import tpu as pltpu


def _bottleneck_kernel(x_ref, w1_ref, b1_ref, w2_ref, b2_ref, m_ref, o_ref, *,
                       W_img, add):
    """One lane-block (nb whole images) per grid step.

    x_ref:  (C1, L)          input slab, L = nb * H*W_pad (lane axis)
    w1_ref: (Cm_pad, C1)     1x1 conv weight, BN1 scale folded, Cm zero-padded
    b1_ref: (Cm_pad, 1)      folded BN1 bias (zero in padded rows)
    w2_ref: (C2, 9*Cm_pad)   3x3 conv weight, rows ordered (kh, kw, cm), BN2
                             scale folded, zero in padded-cm columns
    b2_ref: (C2, 1)          folded BN2 bias
    m_ref:  (9, L)           precomputed per-tap validity masks (f32 0/1)
    o_ref:  (C2, L)          output slab
    """
    x = x_ref[...]                                     # native dtype (f32/bf16)
    L = x.shape[1]

    # ---- cv1: 1x1 conv == matmul, + folded BN bias + SiLU ----------------
    y1 = jnp.dot(w1_ref[...], x, preferred_element_type=jnp.float32)
    y1 = y1 + b1_ref[...]                              # (Cm_pad,1) lane bcast
    y1 = y1 * jax.nn.sigmoid(y1)                       # SiLU

    # ---- im2col taps: XLU rolls x precomputed edge masks ------------------
    taps = []
    t = 0
    for dh in (-1, 0, 1):
        for dw in (-1, 0, 1):
            off = dh * W_img + dw
            shifted = y1 if off == 0 else pltpu.roll(y1, shift=(-off) % L,
                                                     axis=1)
            taps.append(shifted * m_ref[pl.ds(t, 1), :])
            t += 1
    patches = jnp.concatenate(taps, axis=0)            # (9*Cm_pad, L), aligned

    # ---- cv2: 3x3 conv as ONE fused matmul, + folded BN bias + SiLU ------
    y2 = jnp.dot(w2_ref[...], patches, preferred_element_type=jnp.float32)
    y2 = y2 + b2_ref[...]
    y2 = y2 * jax.nn.sigmoid(y2)                       # SiLU

    if add:  # shortcut (static: shortcut and c1 == c2)
        y2 = y2 + x.astype(jnp.float32)

    o_ref[...] = y2.astype(o_ref.dtype)


def _pick_images_per_step(n, hw_pad):
    """Images per grid step: lane tiles of ~2048 (>=512), but keep >=2 grid
    steps when possible so v7x's two TensorCores both get work."""
    nb = min(n, max(1, 2048 // hw_pad))
    while n % nb:
        nb -= 1
    if n // nb == 1 and n > 1:
        half = nb // 2
        while half >= 1 and (n % half or half * hw_pad < 512):
            half -= 1
        if half >= 1:
            nb = half
    return nb


def bottleneck_pallas(x_nchw, w1, s1, b1, w2, s2, b2, *, add):
    """x_nchw: (N,C1,H,W); w1: (C1,Cm); w2: (3,3,Cm,C2) HWIO; s*/b* per-channel."""
    N, C1, H, W = x_nchw.shape
    HW = H * W
    Cm = w1.shape[1]
    C2 = w2.shape[3]

    HW_pad = -(-HW // 128) * 128          # lane-dense per image
    Cm_pad = -(-Cm // 8) * 8              # 8-sublane aligned taps (K = 9*Cm_pad)

    # Fold BN scale into conv weights; zero-pad the hidden channel dim.
    w1f = jnp.zeros((Cm_pad, C1), jnp.float32)
    w1f = w1f.at[:Cm].set((jnp.transpose(w1) * s1[:, None]).astype(jnp.float32))
    b1c = jnp.zeros((Cm_pad, 1), jnp.float32).at[:Cm].set(
        b1.reshape(Cm, 1).astype(jnp.float32))
    w2g = jnp.zeros((9, Cm_pad, C2), jnp.float32)
    w2g = w2g.at[:, :Cm, :].set(w2.reshape(9, Cm, C2).astype(jnp.float32))
    w2f = jnp.transpose(w2g.reshape(9 * Cm_pad, C2)) * s2[:, None]  # (C2, 9*Cm_pad)
    b2c = b2.reshape(C2, 1).astype(jnp.float32)

    nb = _pick_images_per_step(N, HW_pad)
    L_blk = nb * HW_pad
    grid = (N // nb,)

    # Precompute the 9 per-image tap validity masks (zero padding + image
    # boundary); periodic with HW_pad so one (9, L_blk) table serves every step.
    j = jnp.arange(HW_pad, dtype=jnp.int32)
    hh = j // W
    ww = j % W
    in_img = j < HW
    rows = []
    for dh in (-1, 0, 1):
        for dw in (-1, 0, 1):
            rows.append(in_img & (hh + dh >= 0) & (hh + dh < H) &
                        (ww + dw >= 0) & (ww + dw < W))
    mask = jnp.stack(rows, axis=0).astype(jnp.float32)   # (9, HW_pad)
    mask = jnp.tile(mask, (1, nb))                        # (9, L_blk)

    # Fold batch into the lane axis: (N,C1,H*W) -> pad -> (C1, N*HW_pad).
    x2 = x_nchw.reshape(N, C1, HW)
    if HW_pad != HW:
        x2 = jnp.pad(x2, ((0, 0), (0, 0), (0, HW_pad - HW)))
    x_folded = jnp.transpose(x2, (1, 0, 2)).reshape(C1, N * HW_pad)

    kernel = functools.partial(_bottleneck_kernel, W_img=W, add=add)
    out = pl.pallas_call(
        kernel,
        out_shape=jax.ShapeDtypeStruct((C2, N * HW_pad), x_nchw.dtype),
        grid_spec=pltpu.PrefetchScalarGridSpec(
            num_scalar_prefetch=0,
            grid=grid,
            in_specs=[
                pl.BlockSpec((C1, L_blk), lambda i: (0, i)),
                pl.BlockSpec((Cm_pad, C1), lambda i: (0, 0)),
                pl.BlockSpec((Cm_pad, 1), lambda i: (0, 0)),
                pl.BlockSpec((C2, 9 * Cm_pad), lambda i: (0, 0)),
                pl.BlockSpec((C2, 1), lambda i: (0, 0)),
                pl.BlockSpec((9, L_blk), lambda i: (0, 0)),
            ],
            out_specs=pl.BlockSpec((C2, L_blk), lambda i: (0, i)),
        ),
        compiler_params=pltpu.CompilerParams(
            dimension_semantics=("parallel",)),
    )(x_folded, w1f, b1c, w2f, b2c, mask)

    out = out.reshape(C2, N, HW_pad)
    out = jnp.transpose(out, (1, 0, 2))[:, :, :HW].reshape(N, C2, H, W)
    return out


def bottleneck_reference(x_nchw, w1, s1, b1, w2, s2, b2, *, add):
    """Pure-JAX reference (lax.conv, un-folded BN) for correctness checking."""
    x = jnp.transpose(x_nchw, (0, 2, 3, 1))  # NCHW -> NHWC
    dn = ('NHWC', 'HWIO', 'NHWC')
    y1 = lax.conv_general_dilated(x, w1.reshape(1, 1, *w1.shape), (1, 1),
                                  'SAME', dimension_numbers=dn)
    y1 = jax.nn.silu(y1 * s1 + b1)
    y2 = lax.conv_general_dilated(y1, w2, (1, 1), 'SAME', dimension_numbers=dn)
    y2 = jax.nn.silu(y2 * s2 + b2)
    if add:
        y2 = y2 + x
    return jnp.transpose(y2, (0, 3, 1, 2))


def _fold_bn(gamma, beta, mean, var, eps=1e-5):
    scale = gamma / jnp.sqrt(var + eps)
    bias = beta - mean * scale
    return scale, bias


if __name__ == "__main__":
    # Module config: Bottleneck(c1=8, c2=8, shortcut=True, g=1, e=0.5)
    N, C1, H, W = 2, 8, 16, 16
    C2 = 8
    e = 0.5
    Cm = int(C2 * e)
    shortcut = True
    add = shortcut and (C1 == C2)

    key = jax.random.PRNGKey(0)
    ks = jax.random.split(key, 11)

    x = jax.random.normal(ks[0], (N, C1, H, W), jnp.float32)

    # cv1: Conv2d(C1, Cm, 1, bias=False) + BN(Cm)
    w1 = 0.2 * jax.random.normal(ks[1], (C1, Cm), jnp.float32)
    g1 = 1.0 + 0.1 * jax.random.normal(ks[2], (Cm,), jnp.float32)
    be1 = 0.1 * jax.random.normal(ks[3], (Cm,), jnp.float32)
    m1 = 0.1 * jax.random.normal(ks[4], (Cm,), jnp.float32)
    v1 = 0.5 + jax.random.uniform(ks[5], (Cm,), jnp.float32)

    # cv2: Conv2d(Cm, C2, 3, padding=1, bias=False) + BN(C2)
    w2 = 0.2 * jax.random.normal(ks[6], (3, 3, Cm, C2), jnp.float32)
    g2 = 1.0 + 0.1 * jax.random.normal(ks[7], (C2,), jnp.float32)
    be2 = 0.1 * jax.random.normal(ks[8], (C2,), jnp.float32)
    m2 = 0.1 * jax.random.normal(ks[9], (C2,), jnp.float32)
    v2 = 0.5 + jax.random.uniform(ks[10], (C2,), jnp.float32)

    s1, b1 = _fold_bn(g1, be1, m1, v1)
    s2, b2 = _fold_bn(g2, be2, m2, v2)

    out = bottleneck_pallas(x, w1, s1, b1, w2, s2, b2, add=add)
    out = jax.block_until_ready(out)

    ref = bottleneck_reference(x, w1, s1, b1, w2, s2, b2, add=add)
    ref = jax.block_until_ready(ref)

    assert out.shape == (N, C2, H, W)
    assert jnp.allclose(out, ref, atol=1e-4, rtol=1e-4), (
        float(jnp.max(jnp.abs(out - ref))))
    print("KERNEL_OK")
</pallas_src>

<mosaic_0001>
module attributes {stable_mosaic.version = 11 : i64} {
  func.func @_bottleneck_kernel(%arg0: i32, %arg1: memref<8x512xf32, #tpu.memory_space<vmem>>, %arg2: memref<8x8xf32, #tpu.memory_space<vmem>>, %arg3: memref<8x1xf32, #tpu.memory_space<vmem>>, %arg4: memref<8x72xf32, #tpu.memory_space<vmem>>, %arg5: memref<8x1xf32, #tpu.memory_space<vmem>>, %arg6: memref<9x512xf32, #tpu.memory_space<vmem>>, %arg7: memref<8x512xf32, #tpu.memory_space<vmem>>) attributes {dimension_semantics = [#tpu.dimension_semantics<parallel>], iteration_bounds = array<i64: 1>, scalar_prefetch = 0 : i64, scratch_operands = 0 : i64, tpu.core_type = #tpu.core_type<tc>, window_params = [{transform_indices = @transform_0, window_bounds = array<i64: 8, 512>}, {pipeline_mode = #tpu.pipeline_mode<synchronous>, transform_indices = @transform_1, window_bounds = array<i64: 8, 8>}, {pipeline_mode = #tpu.pipeline_mode<synchronous>, transform_indices = @transform_2, window_bounds = array<i64: 8, 1>}, {pipeline_mode = #tpu.pipeline_mode<synchronous>, transform_indices = @transform_3, window_bounds = array<i64: 8, 72>}, {pipeline_mode = #tpu.pipeline_mode<synchronous>, transform_indices = @transform_4, window_bounds = array<i64: 8, 1>}, {pipeline_mode = #tpu.pipeline_mode<synchronous>, transform_indices = @transform_5, window_bounds = array<i64: 9, 512>}, {transform_indices = @transform_6, window_bounds = array<i64: 8, 512>}]} {
    %c0 = arith.constant 0 : index
    %c0_0 = arith.constant 0 : index
    %0 = vector.load %arg1[%c0, %c0_0] : memref<8x512xf32, #tpu.memory_space<vmem>>, vector<8x512xf32>
    %c0_1 = arith.constant 0 : index
    %c0_2 = arith.constant 0 : index
    %1 = vector.load %arg2[%c0_1, %c0_2] : memref<8x8xf32, #tpu.memory_space<vmem>>, vector<8x8xf32>
    %cst = arith.constant dense<0.000000e+00> : vector<8x512xf32>
    %2 = tpu.matmul %1, %0, %cst {dimension_numbers = #tpu.dot_dimension_numbers<[1], [0], [0], [1], [0, 0, 1, 1], [], []>} : vector<8x8xf32>, vector<8x512xf32>, vector<8x512xf32> -> vector<8x512xf32>
    %c0_3 = arith.constant 0 : index
    %c0_4 = arith.constant 0 : index
    %3 = vector.load %arg3[%c0_3, %c0_4] : memref<8x1xf32, #tpu.memory_space<vmem>>, vector<8x1xf32>
    %4 = vector.broadcast %3 : vector<8x1xf32> to vector<8x512xf32>
    %5 = arith.addf %2, %4 : vector<8x512xf32>
    %6 = arith.negf %5 : vector<8x512xf32>
    %7 = math.exp %6 : vector<8x512xf32>
    %cst_5 = arith.constant 1.000000e+00 : f32
    %8 = vector.broadcast %cst_5 : f32 to vector<8x512xf32>
    %9 = arith.addf %8, %7 : vector<8x512xf32>
    %10 = arith.divf %8, %9 : vector<8x512xf32>
    %11 = arith.mulf %5, %10 : vector<8x512xf32>
    %c17_i32 = arith.constant 17 : i32
    %12 = tpu.dynamic_rotate %11 by %c17_i32 dim 1 : vector<8x512xf32>, i32 -> vector<8x512xf32>
    %c0_6 = arith.constant 0 : index
    %c0_7 = arith.constant 0 : index
    %13 = vector.load %arg6[%c0_6, %c0_7] : memref<9x512xf32, #tpu.memory_space<vmem>>, vector<1x512xf32>
    %14 = vector.broadcast %13 : vector<1x512xf32> to vector<8x512xf32>
    %15 = arith.mulf %12, %14 : vector<8x512xf32>
    %c16_i32 = arith.constant 16 : i32
    %16 = tpu.dynamic_rotate %11 by %c16_i32 dim 1 : vector<8x512xf32>, i32 -> vector<8x512xf32>
    %c1 = arith.constant 1 : index
    %c0_8 = arith.constant 0 : index
    %17 = vector.load %arg6[%c1, %c0_8] : memref<9x512xf32, #tpu.memory_space<vmem>>, vector<1x512xf32>
    %18 = vector.broadcast %17 : vector<1x512xf32> to vector<8x512xf32>
    %19 = arith.mulf %16, %18 : vector<8x512xf32>
    %c15_i32 = arith.constant 15 : i32
    %20 = tpu.dynamic_rotate %11 by %c15_i32 dim 1 : vector<8x512xf32>, i32 -> vector<8x512xf32>
    %c2 = arith.constant 2 : index
    %c0_9 = arith.constant 0 : index
    %21 = vector.load %arg6[%c2, %c0_9] : memref<9x512xf32, #tpu.memory_space<vmem>>, vector<1x512xf32>
    %22 = vector.broadcast %21 : vector<1x512xf32> to vector<8x512xf32>
    %23 = arith.mulf %20, %22 : vector<8x512xf32>
    %c1_i32 = arith.constant 1 : i32
    %24 = tpu.dynamic_rotate %11 by %c1_i32 dim 1 : vector<8x512xf32>, i32 -> vector<8x512xf32>
    %c3 = arith.constant 3 : index
    %c0_10 = arith.constant 0 : index
    %25 = vector.load %arg6[%c3, %c0_10] : memref<9x512xf32, #tpu.memory_space<vmem>>, vector<1x512xf32>
    %26 = vector.broadcast %25 : vector<1x512xf32> to vector<8x512xf32>
    %27 = arith.mulf %24, %26 : vector<8x512xf32>
    %c4 = arith.constant 4 : index
    %c0_11 = arith.constant 0 : index
    %28 = vector.load %arg6[%c4, %c0_11] : memref<9x512xf32, #tpu.memory_space<vmem>>, vector<1x512xf32>
    %29 = vector.broadcast %28 : vector<1x512xf32> to vector<8x512xf32>
    %30 = arith.mulf %11, %29 : vector<8x512xf32>
    %c511_i32 = arith.constant 511 : i32
    %31 = tpu.dynamic_rotate %11 by %c511_i32 dim 1 : vector<8x512xf32>, i32 -> vector<8x512xf32>
    %c5 = arith.constant 5 : index
    %c0_12 = arith.constant 0 : index
    %32 = vector.load %arg6[%c5, %c0_12] : memref<9x512xf32, #tpu.memory_space<vmem>>, vector<1x512xf32>
    %33 = vector.broadcast %32 : vector<1x512xf32> to vector<8x512xf32>
    %34 = arith.mulf %31, %33 : vector<8x512xf32>
    %c497_i32 = arith.constant 497 : i32
    %35 = tpu.dynamic_rotate %11 by %c497_i32 dim 1 : vector<8x512xf32>, i32 -> vector<8x512xf32>
    %c6 = arith.constant 6 : index
    %c0_13 = arith.constant 0 : index
    %36 = vector.load %arg6[%c6, %c0_13] : memref<9x512xf32, #tpu.memory_space<vmem>>, vector<1x512xf32>
    %37 = vector.broadcast %36 : vector<1x512xf32> to vector<8x512xf32>
    %38 = arith.mulf %35, %37 : vector<8x512xf32>
    %c496_i32 = arith.constant 496 : i32
    %39 = tpu.dynamic_rotate %11 by %c496_i32 dim 1 : vector<8x512xf32>, i32 -> vector<8x512xf32>
    %c7 = arith.constant 7 : index
    %c0_14 = arith.constant 0 : index
    %40 = vector.load %arg6[%c7, %c0_14] : memref<9x512xf32, #tpu.memory_space<vmem>>, vector<1x512xf32>
    %41 = vector.broadcast %40 : vector<1x512xf32> to vector<8x512xf32>
    %42 = arith.mulf %39, %41 : vector<8x512xf32>
    %c495_i32 = arith.constant 495 : i32
    %43 = tpu.dynamic_rotate %11 by %c495_i32 dim 1 : vector<8x512xf32>, i32 -> vector<8x512xf32>
    %c8 = arith.constant 8 : index
    %c0_15 = arith.constant 0 : index
    %44 = vector.load %arg6[%c8, %c0_15] : memref<9x512xf32, #tpu.memory_space<vmem>>, vector<1x512xf32>
    %45 = vector.broadcast %44 : vector<1x512xf32> to vector<8x512xf32>
    %46 = arith.mulf %43, %45 : vector<8x512xf32>
    %47 = tpu.concatenate %15, %19, %23, %27, %30, %34, %38, %42, %46 in 0 : vector<8x512xf32>, vector<8x512xf32>, vector<8x512xf32>, vector<8x512xf32>, vector<8x512xf32>, vector<8x512xf32>, vector<8x512xf32>, vector<8x512xf32>, vector<8x512xf32> -> vector<72x512xf32>
    %c0_16 = arith.constant 0 : index
    %c0_17 = arith.constant 0 : index
    %48 = vector.load %arg4[%c0_16, %c0_17] : memref<8x72xf32, #tpu.memory_space<vmem>>, vector<8x72xf32>
    %cst_18 = arith.constant dense<0.000000e+00> : vector<8x512xf32>
    %49 = tpu.matmul %48, %47, %cst_18 {dimension_numbers = #tpu.dot_dimension_numbers<[1], [0], [0], [1], [0, 0, 1, 1], [], []>} : vector<8x72xf32>, vector<72x512xf32>, vector<8x512xf32> -> vector<8x512xf32>
    %c0_19 = arith.constant 0 : index
    %c0_20 = arith.constant 0 : index
    %50 = vector.load %arg5[%c0_19, %c0_20] : memref<8x1xf32, #tpu.memory_space<vmem>>, vector<8x1xf32>
    %51 = vector.broadcast %50 : vector<8x1xf32> to vector<8x512xf32>
    %52 = arith.addf %49, %51 : vector<8x512xf32>
    %53 = arith.negf %52 : vector<8x512xf32>
    %54 = math.exp %53 : vector<8x512xf32>
    %cst_21 = arith.constant 1.000000e+00 : f32
    %55 = vector.broadcast %cst_21 : f32 to vector<8x512xf32>
    %56 = arith.addf %55, %54 : vector<8x512xf32>
    %57 = arith.divf %55, %56 : vector<8x512xf32>
    %58 = arith.mulf %52, %57 : vector<8x512xf32>
    %59 = arith.addf %58, %0 : vector<8x512xf32>
    %c0_22 = arith.constant 0 : index
    %c0_23 = arith.constant 0 : index
    %60 = vector.load %arg7[%c0_22, %c0_23] : memref<8x512xf32, #tpu.memory_space<vmem>>, vector<8x512xf32>
    tpu.vector_store %arg7[%c0_22, %c0_23], %59 {strides = array<i32>} : memref<8x512xf32, #tpu.memory_space<vmem>>, vector<8x512xf32>,
    return
  }
  func.func @transform_0(%arg0: i32) -> (i32, i32) {
    %c0_i32 = arith.constant 0 : i32
    %c0_i32_0 = arith.constant 0 : i32
    return %c0_i32, %arg0 : i32, i32
  }
  func.func @transform_1(%arg0: i32) -> (i32, i32) {
    %c0_i32 = arith.constant 0 : i32
    %c0_i32_0 = arith.constant 0 : i32
    %c0_i32_1 = arith.constant 0 : i32
    return %c0_i32, %c0_i32_0 : i32, i32
  }
  func.func @transform_2(%arg0: i32) -> (i32, i32) {
    %c0_i32 = arith.constant 0 : i32
    %c0_i32_0 = arith.constant 0 : i32
    %c0_i32_1 = arith.constant 0 : i32
    return %c0_i32, %c0_i32_0 : i32, i32
  }
  func.func @transform_3(%arg0: i32) -> (i32, i32) {
    %c0_i32 = arith.constant 0 : i32
    %c0_i32_0 = arith.constant 0 : i32
    %c0_i32_1 = arith.constant 0 : i32
    return %c0_i32, %c0_i32_0 : i32, i32
  }
  func.func @transform_4(%arg0: i32) -> (i32, i32) {
    %c0_i32 = arith.constant 0 : i32
    %c0_i32_0 = arith.constant 0 : i32
    %c0_i32_1 = arith.constant 0 : i32
    return %c0_i32, %c0_i32_0 : i32, i32
  }
  func.func @transform_5(%arg0: i32) -> (i32, i32) {
    %c0_i32 = arith.constant 0 : i32
    %c0_i32_0 = arith.constant 0 : i32
    %c0_i32_1 = arith.constant 0 : i32
    return %c0_i32, %c0_i32_0 : i32, i32
  }
  func.func @transform_6(%arg0: i32) -> (i32, i32) {
    %c0_i32 = arith.constant 0 : i32
    %c0_i32_0 = arith.constant 0 : i32
    return %c0_i32, %arg0 : i32, i32
  }
}

</mosaic_0001>

<bundles_post_ra>
// kernel: tpu_custom_call.1
= control target key start
LH: loop header
LB: loop body
LE: loop exit
PB: predicated region body
PF: predicated region fallthrough
CT: control target
= control target key end

     0   :  { %11 = vsyncpa [#allocation3], 0  ;;  %s1284_s0 = inlined_call_operand.hbm [shape: f32[8,512], index: 0, kind: input, shape index: {}]   ;;  %s1285_s1 = inlined_call_operand.vmem [shape: f32[8,8], index: 1, kind: input, shape index: {}]   ;;  %s1286_s2 = inlined_call_operand.vmem [shape: f32[8,1], index: 2, kind: input, shape index: {}]   ;;  %s1287_s3 = inlined_call_operand.vmem [shape: f32[8,72], index: 3, kind: input, shape index: {}]   ;;  %s1288_s4 = inlined_call_operand.vmem [shape: f32[8,1], index: 4, kind: input, shape index: {}]   ;;  %s1289_s5 = inlined_call_operand.hbm [shape: f32[9,512], index: 5, kind: input, shape index: {}]   ;;  %s1290_s6 = inlined_call_operand.hbm [shape: f32[8,512], index: 6, kind: output, shape index: {}]  }
   0x1   :  { %12 = vsyncpa [#allocation6], 0 }
   0x2   :  { %13 = vsyncpa [#allocation4], 0  ;;  %s915_s21 = smov [#allocation2]   ;;  %s916_s23 = smov [#allocation5]  }
   0x3   :  { %s20_s22 = sshll.u32 %s915_s21, 4  ;;  %s37_s24 = sshll.u32 %s916_s23, 4  ;;  %s21_s22 = int_to_ptr.vmem [resolvable:$true] %s20_s22  ;;  %s38_s24 = int_to_ptr.vmem [resolvable:$true] %s37_s24 }
   0x4   :  { %s857_s25 = scalar_lea.vmem %s21_s22, 512  ;;  %p862_p1 = scmp.lt.s32.totalorder %s21_s22, %s21_s22 }
   0x5   :  { %p858_p0 = scmp.ne.s32.totalorder %s21_s22, %s857_s25  ;;  %p863_p2 = scmp.lt.s32.totalorder %s857_s25, %s857_s25 }
   0x7   :  { %p864_p3 = por %p863_p2, %p862_p1 }
   0x9   :  { %p865_p4 = pnand %p864_p3, %p858_p0 }
   0xb   :  { %868 = shalt.err (!%p865_p4)
}
   0xc   :  { %23 = dma.hbm_to_vmem [thread:$0]  %s1284_s0, 512, %s21_s22, [#allocation3]  }
   0xd   :  { %s877_s28 = scalar_lea.vmem %s38_s24, 1024  ;;  %p882_p6 = scmp.lt.s32.totalorder %s38_s24, %s38_s24 }
   0xe   :  { %p878_p5 = scmp.ne.s32.totalorder %s38_s24, %s877_s28  ;;  %p883_p7 = scmp.lt.s32.totalorder %s877_s28, %s877_s28 }
  0x10   :  { %p884_p8 = por %p883_p7, %p882_p6 }
  0x12   :  { %p885_p9 = pnand %p884_p8, %p878_p5 }
  0x14   :  { %888 = shalt.err (!%p885_p9)
}
  0x15   :  { %s917_s29 = smov 512   ;;  %s918_s30 = smov 32  }
  0x16   :  { %43 = dma.hbm_to_vmem [thread:$0]  %s1289_s5, 1024, %s38_s24, [#allocation6], %s917_s29, %s917_s29, %s918_s30  }
  0x17   :  { %909 = dma.done.wait [#allocation3], 512  }
  0x18   :  { %910 = vsyncadd [#allocation3], 4294966784 }
  0x19   :  { %911 = dma.done.wait [#allocation6], 1024  }
  0x1a   :  { %912 = vsyncadd [#allocation6], 4294966272  ;;  %v919_v0 = vmov 0.0   ;;  %v920_v1 = vmov 0   ;;  %v971_v2 = vld [vmem:[#allocation2 + $0x8] sm:$0xff]  ;;  %v973_v3 = vld [vmem:[#allocation2 + $0x18] sm:$0xff]  ;;  %v243_v38 = vlaneseq }
  0x1b   :  { %129 = vmatprep.mubr.f32.mxu0 %v919_v0  ;;  %200 = vmatprep.mubr.f32.mxu1 %v919_v0  ;;  %v975_v4 = vld [vmem:[#allocation2] sm:$0xff]  ;;  %vm61_vm0 = vcmask 64512   ;;  %v979_v5 = vld [vmem:[#allocation2 + $0x10] sm:$0xff]  ;;  %s923_s11 = smov 113   ;;  %s924_s12 = smov 127   ;;  %vm590_vm9 = vcmask 588800  }
  0x1c   :  { %815 = vset.pattern.permute.xlu0 %v920_v1  ;;  %816 = vset.pattern.permute.xlu1 %v920_v1  ;;  %v54_v6 = vld [vmem:[%s1285_s1] sm:$0xff]  ;;  %s921_s1 = smov 111   ;;  %s925_s13 = smov 1   ;;  %v1036_v39 = vshrl.u32 %v243_v38, 7  ;;  %v1038_v40 = vand.u32 127, %v243_v38 }
  0x1d   :  { %95 = vmatprep.subr.mxu0 %v971_v2  ;;  %166 = vmatprep.subr.mxu1 %v973_v3  ;;  %v55_v7 = vld [vmem:[%s1286_s2] sm:$0xff]  ;;  %s922_s2 = smov 112   ;;  %s926_s14 = smov 15  }
  0x1e   :  { %96 = vmatpush1.msra.mxu0 %v975_v4  ;;  %167 = vmatpush1.msra.mxu1 %v979_v5  ;;  %s927_s15 = smov 16   ;;  %s928_s16 = smov 17   ;;  %v584_v37 = vld [vmem:[%s1288_s4] sm:$0xff]  ;;  %v1045_v43 = vsub.s32 2, %v1036_v39  ;;  %v1048_v44 = vsub.s32 3, %v1036_v39  ;;  %vm551_vm1 = vcmp.lt.s32.totalorder %v1038_v40, 111 }
  0x1f   :  { %788 = vmatmul.mubr.msk.f32.vlgmr.msra.gmra.mxu0 %vm61_vm0, %v54_v6  ;;  %789 = vmatmul.mubr.msk.f32.vlgmr.msra.gmra.mxu1 %vm61_vm0, %v54_v6  ;;  %v1040_v41 = vld [vmem:[#allocation5 + $0x20] ss:$8 sm:$0xf]  ;;  %v1069_v56 = vld [vmem:[#allocation5 + $0x7] ss:$8 sm:$0xf] }
  0x20   :  { %58 = vperm.xlu0 %815, %v55_v7   ;;  %658 = vmatprep.mubr.f32.mxu0 %v919_v0  ;;  %v570_v46 = vrot.slane %v1040_v41, %v1045_v43  ;;  %v574_v47 = vrot.slane %v1040_v41, %v1048_v44  ;;  %v530_v57 = vrot.slane %v1069_v56, %v1045_v43  ;;  %vm511_vm2 = vcmp.lt.s32.totalorder %v1038_v40, 112  ;;  %v1088_v7 = vld [vmem:[#allocation5 + $0x6] ss:$8 sm:$0xf] }
  0x21   :  { %729 = vmatprep.mubr.f32.mxu1 %v919_v0  ;;  %v534_v58 = vrot.slane %v1069_v56, %v1048_v44  ;;  %vm471_vm3 = vcmp.lt.s32.totalorder %v1038_v40, 113  ;;  %vm431_vm4 = vcmp.lt.s32.totalorder %v1038_v40, 127  ;;  %vm364_vm5 = vcmp.lt.s32.totalorder %v1038_v40, 1 }
  0x22   :  { %vm324_vm6 = vcmp.lt.s32.totalorder %v1038_v40, 15  ;;  %vm284_vm7 = vcmp.lt.s32.totalorder %v1038_v40, 16  ;;  %vm245_vm8 = vcmp.lt.s32.totalorder %v1038_v40, 17 }
  0x9b   :  { %v59_v8 = vpop.permute.xlu0 %58 }
  0xdf   :  { %v131_v9 = vpop.f32.mrf.mxu0  ;;  %v202_v10 = vpop.f32.mrf.mxu1 }
  0xe0   :  { %v132_v11 = vadd.f32 %v131_v9, %v59_v8  ;;  %v203_v12 = vadd.f32 %v202_v10, %v59_v8  ;;  %v494_v9 = vrot.slane %v1088_v7, %v1048_v44 }
  0xe1   :  { %v133_v13 = vpop.f32.mrf.mxu0  ;;  %v204_v14 = vpop.f32.mrf.mxu1 }
  0xe2   :  { %v790_v15 = vmul.f32 -1.442695, %v132_v11  ;;  %v792_v16 = vmul.f32 -1.442695, %v203_v12  ;;  %v134_v17 = vadd.f32 %v133_v13, %v59_v8  ;;  %v205_v18 = vadd.f32 %v204_v14, %v59_v8 }
  0xe3   :  { %v490_v8 = vrot.slane %v1088_v7, %v1045_v43 }
  0xe4   :  { %817 = vpow2.f32 %v790_v15  ;;  %v791_v19 = vmul.f32 -1.442695, %v134_v17  ;;  %v793_v20 = vmul.f32 -1.442695, %v205_v18 }
  0xe5   :  { %819 = vpow2.f32 %v792_v16 }
  0xe6   :  { %821 = vpow2.f32 %v791_v19 }
  0xe7   :  { %823 = vpow2.f32 %v793_v20 }
  0xf1   :  { %v818_v21 = vpop.eup %817 }
  0xf2   :  { %v820_v22 = vpop.eup %819  ;;  %v219_v23 = vadd.f32 1.0, %v818_v21  ;;  %v1113_v21 = vld [vmem:[#allocation5 + $0x4] ss:$8 sm:$0xf] }
  0xf3   :  { %v822_v24 = vpop.eup %821  ;;  %v221_v25 = vadd.f32 1.0, %v820_v22 }
  0xf4   :  { %v824_v26 = vpop.eup %823  ;;  %825 = vrcp.f32 %v219_v23  ;;  %v220_v28 = vadd.f32 1.0, %v822_v24  ;;  %v414_v23 = vrot.slane %v1113_v21, %v1048_v44 }
  0xf5   :  { %827 = vrcp.f32 %v221_v25  ;;  %v222_v27 = vadd.f32 1.0, %v824_v26 }
  0xf7   :  { %829 = vrcp.f32 %v222_v27  ;;  %v410_v27 = vrot.slane %v1113_v21, %v1045_v43 }
  0xf8   :  { %831 = vrcp.f32 %v220_v28 }
 0x101   :  { %v826_v29 = vpop.eup %825 }
 0x102   :  { %v828_v30 = vpop.eup %827  ;;  %v989_v31 = vmul.f32 %v826_v29, %v132_v11 }
 0x103   :  { %v991_v32 = vmul.f32 %v828_v30, %v203_v12  ;;  %v1128_v30 = vld [vmem:[#allocation5 + $0x3] ss:$8 sm:$0xf] }
 0x104   :  { %v830_v33 = vpop.eup %829  ;;  %543 = vrot.lane.b32.xlu0 %v989_v31, %s921_s1 }
 0x105   :  { %547 = vrot.lane.b32.xlu1 %v991_v32, %s921_s1  ;;  %v997_v34 = vmul.f32 %v830_v33, %v205_v18  ;;  %v832_v35 = vpop.eup %831  ;;  %v1107_v18 = vld [vmem:[#allocation5 + $0x5] ss:$8 sm:$0xf]  ;;  %v421_v38 = vmul.f32 %v410_v27, %v991_v32 }
 0x106   :  { %v1002_v36 = vmul.f32 %v832_v35, %v134_v17  ;;  %v450_v19 = vrot.slane %v1107_v18, %v1045_v43  ;;  %v454_v20 = vrot.slane %v1107_v18, %v1048_v44 }
 0x107   :  { %v422_v35 = vmul.f32 %v414_v23, %v997_v34 }
 0x108   :  { %549 = vrot.lane.b32.xlu0 %v997_v34, %s921_s1 }
 0x109   :  { %503 = vrot.lane.b32.xlu1 %v989_v31, %s922_s2 }
 0x10c   :  { %505 = vrot.lane.b32.xlu0 %v1002_v36, %s922_s2 }
 0x10d   :  { %507 = vrot.lane.b32.xlu1 %v991_v32, %s922_s2 }
 0x110   :  { %509 = vrot.lane.b32.xlu0 %v997_v34, %s922_s2 }
 0x111   :  { %463 = vrot.lane.b32.xlu1 %v989_v31, %s923_s11 }
 0x114   :  { %465 = vrot.lane.b32.xlu0 %v1002_v36, %s923_s11 }
 0x115   :  { %467 = vrot.lane.b32.xlu1 %v991_v32, %s923_s11 }
 0x118   :  { %469 = vrot.lane.b32.xlu0 %v997_v34, %s923_s11 }
 0x119   :  { %423 = vrot.lane.b32.xlu1 %v989_v31, %s924_s12 }
 0x11c   :  { %425 = vrot.lane.b32.xlu0 %v1002_v36, %s924_s12 }
 0x11d   :  { %427 = vrot.lane.b32.xlu1 %v991_v32, %s924_s12 }
 0x120   :  { %429 = vrot.lane.b32.xlu0 %v997_v34, %s924_s12 }
 0x121   :  { %356 = vrot.lane.b32.xlu1 %v989_v31, %s925_s13 }
 0x124   :  { %358 = vrot.lane.b32.xlu0 %v1002_v36, %s925_s13 }
 0x125   :  { %360 = vrot.lane.b32.xlu1 %v991_v32, %s925_s13 }
 0x128   :  { %362 = vrot.lane.b32.xlu0 %v997_v34, %s925_s13 }
 0x129   :  { %316 = vrot.lane.b32.xlu1 %v989_v31, %s926_s14 }
 0x12c   :  { %318 = vrot.lane.b32.xlu0 %v1002_v36, %s926_s14 }
 0x12d   :  { %320 = vrot.lane.b32.xlu1 %v991_v32, %s926_s14 }
 0x130   :  { %322 = vrot.lane.b32.xlu0 %v997_v34, %s926_s14 }
 0x131   :  { %545 = vrot.lane.b32.xlu1 %v1002_v36, %s921_s1 }
 0x134   :  { %278 = vrot.lane.b32.xlu0 %v1002_v36, %s927_s15 }
 0x135   :  { %276 = vrot.lane.b32.xlu1 %v989_v31, %s927_s15 }
 0x138   :  { %282 = vrot.lane.b32.xlu0 %v997_v34, %s927_s15 }
 0x139   :  { %280 = vrot.lane.b32.xlu1 %v991_v32, %s927_s15 }
 0x13c   :  { %237 = vrot.lane.b32.xlu0 %v1002_v36, %s928_s16 }
 0x13d   :  { %235 = vrot.lane.b32.xlu1 %v989_v31, %s928_s16 }
 0x140   :  { %241 = vrot.lane.b32.xlu0 %v997_v34, %s928_s16 }
 0x141   :  { %239 = vrot.lane.b32.xlu1 %v991_v32, %s928_s16 }
 0x145   :  { %587 = vperm.xlu1 %816, %v584_v37  }
 0x176   :  { %v1042_v42 = vpop.permute.xlu0 %543 }
 0x177   :  { %v1050_v45 = vpop.permute.xlu1 %547 }
 0x17a   :  { %v550_v48 = vpop.permute.xlu0 %549 }
 0x17b   :  { %v1057_v49 = vpop.permute.xlu1 %503  ;;  %v552_v50 = vsel %vm551_vm1, %v1050_v45, %v550_v48  ;;  %v555_v51 = vsel %vm551_vm1, %v550_v48, %v1042_v42 }
 0x17c   :  { %v581_v52 = vmul.f32 %v570_v46, %v552_v50  ;;  %v582_v53 = vmul.f32 %v574_v47, %v555_v51  ;;  %v387_v46 = vrot.slane %v1128_v30, %v1048_v44  ;;  %v383_v47 = vrot.slane %v1128_v30, %v1045_v43 }
 0x17e   :  { %679 = vmatprep.subr.mxu1 %v582_v53  ;;  %v1065_v54 = vpop.permute.xlu0 %505  ;;  %v1149_v53 = vld [vmem:[#allocation5 + $0x2] ss:$8 sm:$0xf] }
 0x17f   :  { %v1067_v55 = vpop.permute.xlu1 %507  ;;  %680 = vmatpush1.msra.mxu1 %v581_v52 }
 0x182   :  { %v510_v59 = vpop.permute.xlu0 %509 }
 0x183   :  { %v1076_v60 = vpop.permute.xlu1 %463  ;;  %v512_v61 = vsel %vm511_vm2, %v1067_v55, %v510_v59  ;;  %v515_v62 = vsel %vm511_vm2, %v510_v59, %v1057_v49  ;;  %v1157_v59 = vsub.s32 1, %v1036_v39 }
 0x184   :  { %v541_v63 = vmul.f32 %v530_v57, %v512_v61  ;;  %v542_v0 = vmul.f32 %v534_v58, %v515_v62  ;;  %v1154_v58 = vsub.s32 0, %v1036_v39  ;;  %v347_v62 = vrot.slane %v1149_v53, %v1048_v44 }
 0x186   :  { %681 = vmatprep.subr.mxu1 %v542_v0  ;;  %v1084_v1 = vpop.permute.xlu0 %465  ;;  %v562_v0 = vrot.slane %v1040_v41, %v1154_v58 }
 0x187   :  { %v1086_v6 = vpop.permute.xlu1 %467  ;;  %682 = vmatpush1.msra.mxu1 %v541_v63  ;;  %v343_v63 = vrot.slane %v1149_v53, %v1045_v43 }
 0x18a   :  { %v470_v10 = vpop.permute.xlu0 %469 }
 0x18b   :  { %v1095_v11 = vpop.permute.xlu1 %423  ;;  %v472_v12 = vsel %vm471_vm3, %v1086_v6, %v470_v10  ;;  %v475_v13 = vsel %vm471_vm3, %v470_v10, %v1076_v60  ;;  %v522_v10 = vrot.slane %v1069_v56, %v1154_v58 }
 0x18c   :  { %v501_v14 = vmul.f32 %v490_v8, %v472_v12  ;;  %v502_v15 = vmul.f32 %v494_v9, %v475_v13  ;;  %v566_v8 = vrot.slane %v1040_v41, %v1157_v59  ;;  %v526_v12 = vrot.slane %v1069_v56, %v1157_v59 }
 0x18d   :  { %v486_v13 = vrot.slane %v1088_v7, %v1157_v59 }
 0x18e   :  { %683 = vmatprep.subr.mxu1 %v502_v15  ;;  %v1103_v16 = vpop.permute.xlu0 %425  ;;  %v513_v15 = vsel %vm511_vm2, %v1065_v54, %v1067_v55  ;;  %v482_v55 = vrot.slane %v1088_v7, %v1154_v58  ;;  %v446_v7 = vrot.slane %v1107_v18, %v1157_v59 }
 0x18f   :  { %v1105_v17 = vpop.permute.xlu1 %427  ;;  %684 = vmatpush1.msra.mxu1 %v501_v14 }
 0x192   :  { %v430_v22 = vpop.permute.xlu0 %429 }
 0x193   :  { %v1118_v24 = vpop.permute.xlu1 %356  ;;  %v432_v25 = vsel %vm431_vm4, %v1105_v17, %v430_v22  ;;  %v435_v26 = vsel %vm431_vm4, %v430_v22, %v1095_v11  ;;  %v514_v22 = vsel %vm511_vm2, %v1057_v49, %v1065_v54  ;;  %v540_v49 = vmul.f32 %v526_v12, %v513_v15 }
 0x194   :  { %v461_v28 = vmul.f32 %v450_v19, %v432_v25  ;;  %v462_v29 = vmul.f32 %v454_v20, %v435_v26  ;;  %v474_v54 = vsel %vm471_vm3, %v1076_v60, %v1084_v1  ;;  %v434_v60 = vsel %vm431_vm4, %v1095_v11, %v1103_v16 }
 0x196   :  { %685 = vmatprep.subr.mxu1 %v462_v29  ;;  %v1130_v33 = vpop.permute.xlu0 %358 }
 0x197   :  { %v361_v37 = vpop.permute.xlu1 %360  ;;  %686 = vmatpush1.msra.mxu1 %v461_v28  ;;  %v402_v28 = vrot.slane %v1113_v21, %v1154_v58 }
 0x198   :  { %687 = vmatprep.subr.mxu1 %v422_v35  ;;  %v366_v48 = vsel %vm364_vm5, %v1130_v33, %v361_v37  ;;  %v442_v35 = vrot.slane %v1107_v18, %v1154_v58 }
 0x199   :  { %688 = vmatpush1.msra.mxu1 %v421_v38  ;;  %v394_v52 = vmul.f32 %v383_v47, %v366_v48  ;;  %v499_v47 = vmul.f32 %v482_v55, %v474_v54 }
 0x19a   :  { %v1142_v50 = vpop.permute.xlu0 %362 }
 0x19b   :  { %v1144_v34 = vpop.permute.xlu1 %316  ;;  %v365_v32 = vsel %vm364_vm5, %v361_v37, %v1142_v50  ;;  %v290_v37 = vld [vmem:[#allocation5 + $0x1] ss:$8 sm:$0xf] }
 0x19c   :  { %v395_v51 = vmul.f32 %v387_v46, %v365_v32  ;;  %v307_v46 = vrot.slane %v290_v37, %v1048_v44  ;;  %v295_v12 = vrot.slane %v290_v37, %v1154_v58 }
 0x19e   :  { %689 = vmatprep.subr.mxu1 %v395_v51  ;;  %v1151_v57 = vpop.permute.xlu0 %318  ;;  %v379_v51 = vrot.slane %v1128_v30, %v1157_v59 }
 0x19f   :  { %v321_v61 = vpop.permute.xlu1 %320  ;;  %690 = vmatpush1.msra.mxu1 %v394_v52  ;;  %v375_v52 = vrot.slane %v1128_v30, %v1154_v58  ;;  %v368_v30 = vsel %vm364_vm5, %v1142_v50, %v1118_v24 }
 0x1a0   :  { %v326_v39 = vsel %vm324_vm6, %v1151_v57, %v321_v61 }
 0x1a1   :  { %v354_v23 = vmul.f32 %v343_v63, %v326_v39  ;;  %v339_v63 = vrot.slane %v1149_v53, %v1157_v59  ;;  %v335_v39 = vrot.slane %v1149_v53, %v1154_v58  ;;  %v392_v53 = vmul.f32 %v375_v52, %v368_v30 }
 0x1a2   :  { %v1171_v9 = vpop.permute.xlu0 %322 }
 0x1a3   :  { %v546_v14 = vpop.permute.xlu1 %545  ;;  %v325_v41 = vsel %vm324_vm6, %v321_v61, %v1171_v9  ;;  %v367_v61 = vsel %vm364_vm5, %v1118_v24, %v1130_v33  ;;  %v327_v33 = vsel %vm324_vm6, %v1144_v34, %v1151_v57 }
 0x1a4   :  { %v553_v19 = vsel %vm551_vm1, %v546_v14, %v1050_v45  ;;  %v554_v56 = vsel %vm551_vm1, %v1042_v42, %v546_v14  ;;  %v355_v20 = vmul.f32 %v347_v62, %v325_v41  ;;  %v473_v45 = vsel %vm471_vm3, %v1084_v1, %v1086_v6  ;;  %v250_v62 = vld [vmem:[#allocation5] ss:$8 sm:$0xf] }
 0x1a5   :  { %v579_v25 = vmul.f32 %v562_v0, %v554_v56  ;;  %v580_v26 = vmul.f32 %v566_v8, %v553_v19  ;;  %v406_v42 = vrot.slane %v1113_v21, %v1157_v59  ;;  %v539_v6 = vmul.f32 %v522_v10, %v514_v22 }
 0x1a6   :  { %691 = vmatprep.subr.mxu1 %v355_v20  ;;  %v279_v27 = vpop.permute.xlu0 %278  ;;  %v433_v21 = vsel %vm431_vm4, %v1103_v16, %v1105_v17  ;;  %v500_v38 = vmul.f32 %v486_v13, %v473_v45  ;;  %v303_v1 = vrot.slane %v290_v37, %v1045_v43  ;;  %v419_v17 = vmul.f32 %v402_v28, %v989_v31  ;;  %v583_v28 = vld [vmem:[%s1287_s3] sm:$0xff]  ;;  %s929_s3 = smov [#allocation7]  }
 0x1a7   :  { %608 = vmatprep.subr.mxu0 %v580_v26  ;;  %v277_v29 = vpop.permute.xlu1 %276  ;;  %692 = vmatpush1.msra.mxu1 %v354_v23  ;;  %v420_v48 = vmul.f32 %v406_v42, %v1002_v36  ;;  %v460_v32 = vmul.f32 %v446_v7, %v433_v21  ;;  %v459_v16 = vmul.f32 %v442_v35, %v434_v60  ;;  %s778_s20 = sshll.u32 %s929_s3, 4  ;;  %s779_s20 = int_to_ptr.vmem [resolvable:$true] %s778_s20 }
 0x1a8   :  { %609 = vmatpush1.msra.mxu0 %v579_v25  ;;  %v299_v10 = vrot.slane %v290_v37, %v1157_v59  ;;  %v393_v50 = vmul.f32 %v379_v51, %v367_v61  ;;  %v328_v13 = vsel %vm324_vm6, %v1171_v9, %v1144_v34  ;;  %v259_v57 = vrot.slane %v250_v62, %v1157_v59  ;;  %s889_s21 = scalar_lea.vmem %s779_s20, 512  ;;  %p894_p11 = scmp.lt.s32.totalorder %s779_s20, %s779_s20 }
 0x1a9   :  { %610 = vmatprep.subr.mxu0 %v540_v49  ;;  %v287_v41 = vsel %vm284_vm7, %v277_v29, %v279_v27  ;;  %v255_v15 = vrot.slane %v250_v62, %v1154_v58  ;;  %v353_v19 = vmul.f32 %v339_v63, %v327_v33  ;;  %v263_v34 = vrot.slane %v250_v62, %v1045_v43  ;;  %p890_p10 = scmp.ne.s32.totalorder %s779_s20, %s889_s21  ;;  %p895_p12 = scmp.lt.s32.totalorder %s889_s21, %s889_s21 }
 0x1aa   :  { %611 = vmatpush1.msra.mxu0 %v539_v6  ;;  %v283_v18 = vpop.permute.xlu0 %282  ;;  %v267_v9 = vrot.slane %v250_v62, %v1048_v44  ;;  %v352_v20 = vmul.f32 %v335_v39, %v328_v13  ;;  %v313_v23 = vmul.f32 %v299_v10, %v287_v41 }
 0x1ab   :  { %v281_v11 = vpop.permute.xlu1 %280  ;;  %612 = vmatprep.subr.mxu0 %v500_v38  ;;  %v288_v56 = vsel %vm284_vm7, %v283_v18, %v277_v29  ;;  %p896_p13 = por %p895_p12, %p894_p11 }
 0x1ac   :  { %v286_v31 = vsel %vm284_vm7, %v279_v27, %v281_v11  ;;  %v285_v36 = vsel %vm284_vm7, %v281_v11, %v283_v18  ;;  %613 = vmatpush1.msra.mxu0 %v499_v47  ;;  %v312_v26 = vmul.f32 %v295_v12, %v288_v56 }
 0x1ad   :  { %v314_v0 = vmul.f32 %v303_v1, %v286_v31  ;;  %v315_v8 = vmul.f32 %v307_v46, %v285_v36  ;;  %614 = vmatprep.subr.mxu0 %v460_v32  ;;  %p897_p0 = pnand %p896_p13, %p890_p10 }
 0x1ae   :  { %615 = vmatpush1.msra.mxu0 %v459_v16  ;;  %v238_v24 = vpop.permute.xlu0 %237 }
 0x1af   :  { %v236_v14 = vpop.permute.xlu1 %235  ;;  %616 = vmatprep.subr.mxu0 %v420_v48  ;;  %693 = vmatprep.subr.mxu1 %v315_v8 }
 0x1b0   :  { %617 = vmatpush1.msra.mxu0 %v419_v17  ;;  %694 = vmatpush1.msra.mxu1 %v314_v0  ;;  %v248_v59 = vsel %vm245_vm8, %v236_v14, %v238_v24 }
 0x1b1   :  { %618 = vmatprep.subr.mxu0 %v393_v50  ;;  %v273_v45 = vmul.f32 %v259_v57, %v248_v59 }
 0x1b2   :  { %619 = vmatpush1.msra.mxu0 %v392_v53  ;;  %v242_v22 = vpop.permute.xlu0 %241 }
 0x1b3   :  { %v240_v25 = vpop.permute.xlu1 %239  ;;  %v249_v58 = vsel %vm245_vm8, %v242_v22, %v236_v14  ;;  %620 = vmatprep.subr.mxu0 %v353_v19 }
 0x1b4   :  { %v247_v55 = vsel %vm245_vm8, %v238_v24, %v240_v25  ;;  %v246_v43 = vsel %vm245_vm8, %v240_v25, %v242_v22  ;;  %v272_v44 = vmul.f32 %v255_v15, %v249_v58  ;;  %621 = vmatpush1.msra.mxu0 %v352_v20 }
 0x1b5   :  { %v274_v27 = vmul.f32 %v263_v34, %v247_v55  ;;  %v275_v42 = vmul.f32 %v267_v9, %v246_v43  ;;  %622 = vmatprep.subr.mxu0 %v313_v23 }
 0x1b6   :  { %623 = vmatpush1.msra.mxu0 %v312_v26 }
 0x1b7   :  { %624 = vmatprep.subr.mxu0 %v273_v45  ;;  %695 = vmatprep.subr.mxu1 %v275_v42 }
 0x1b8   :  { %625 = vmatpush1.msra.mxu0 %v272_v44  ;;  %696 = vmatpush1.msra.mxu1 %v274_v27 }
 0x1b9   :  { %794 = vmatmul.mubr.msk.f32.vlgmr.msra.gmra.mxu0 %vm590_vm9, %v583_v28  ;;  %795 = vmatmul.mubr.msk.f32.vlgmr.msra.gmra.mxu1 %vm590_vm9, %v583_v28 }
 0x1c0   :  { %v588_v40 = vpop.permute.xlu1 %587 }
 0x279   :  { %v660_v49 = vpop.f32.mrf.mxu0  ;;  %v731_v54 = vpop.f32.mrf.mxu1 }
 0x27a   :  { %v661_v7 = vadd.f32 %v660_v49, %v588_v40  ;;  %v732_v29 = vadd.f32 %v731_v54, %v588_v40 }
 0x27b   :  { %v662_v6 = vpop.f32.mrf.mxu0  ;;  %v733_v35 = vpop.f32.mrf.mxu1 }
 0x27c   :  { %v796_v21 = vmul.f32 -1.442695, %v661_v7  ;;  %v798_v37 = vmul.f32 -1.442695, %v732_v29  ;;  %v663_v38 = vadd.f32 %v662_v6, %v588_v40  ;;  %v734_v60 = vadd.f32 %v733_v35, %v588_v40 }
 0x27e   :  { %833 = vpow2.f32 %v796_v21  ;;  %v797_v1 = vmul.f32 -1.442695, %v663_v38  ;;  %v799_v46 = vmul.f32 -1.442695, %v734_v60 }
 0x27f   :  { %835 = vpow2.f32 %v798_v37 }
 0x280   :  { %837 = vpow2.f32 %v797_v1 }
 0x281   :  { %839 = vpow2.f32 %v799_v46 }
 0x28b   :  { %v834_v47 = vpop.eup %833 }
 0x28c   :  { %v836_v18 = vpop.eup %835  ;;  %v748_v48 = vadd.f32 1.0, %v834_v47 }
 0x28d   :  { %v838_v17 = vpop.eup %837  ;;  %v750_v32 = vadd.f32 1.0, %v836_v18 }
 0x28e   :  { %v840_v51 = vpop.eup %839  ;;  %841 = vrcp.f32 %v748_v48  ;;  %v749_v52 = vadd.f32 1.0, %v838_v17 }
 0x28f   :  { %843 = vrcp.f32 %v750_v32  ;;  %v751_v11 = vadd.f32 1.0, %v840_v51 }
 0x290   :  { %845 = vrcp.f32 %v749_v52 }
 0x291   :  { %847 = vrcp.f32 %v751_v11 }
 0x29b   :  { %v842_v16 = vpop.eup %841 }
 0x29c   :  { %v844_v61 = vpop.eup %843  ;;  %v760_v31 = vmul.f32 %v842_v16, %v661_v7 }
 0x29d   :  { %v846_v36 = vpop.eup %845  ;;  %v762_v62 = vmul.f32 %v844_v61, %v732_v29 }
 0x29e   :  { %v848_v30 = vpop.eup %847  ;;  %v764_v63 = vadd.f32 %v760_v31, %v975_v4  ;;  %v761_v0 = vmul.f32 %v846_v36, %v663_v38 }
 0x29f   :  { %v766_v8 = vadd.f32 %v762_v62, %v979_v5  ;;  %v763_v33 = vmul.f32 %v848_v30, %v734_v60 }
 0x2a0   :  { %768 = vst [vmem:[#allocation7] sm:$0xff] %v764_v63  ;;  %v765_v39 = vadd.f32 %v761_v0, %v971_v2 }
 0x2a1   :  { %770 = vst [vmem:[#allocation7 + $0x10] sm:$0xff] %v766_v8  ;;  %v767_v10 = vadd.f32 %v763_v33, %v973_v3 }
 0x2a2   :  { %769 = vst [vmem:[#allocation7 + $0x8] sm:$0xff] %v765_v39 }
 0x2a3   :  { %771 = vst [vmem:[#allocation7 + $0x18] sm:$0xff] %v767_v10 }
 0x2a4   :  { %900 = shalt.err (!%p897_p0)
}
 0x2a5   :  { %781 = dma.vmem_to_hbm [thread:$0]  %s779_s20, 512, %s1290_s6, [#allocation4]  }
 0x2a6   :  { %913 = dma.done.wait [#allocation4], 512  }
 0x2a7   :  { %914 = vsyncadd [#allocation4], 4294966784 }
 0x2a8   :  { %785 = vsyncpa [#allocation3], 1 }
 0x2a9   :  { %786 = vsyncpa [#allocation6], 1 }
 0x2aa   :  { %787 = vsyncpa [#allocation4], 1 }

</bundles_post_ra>
